<compile_context>
chip_gen: v7x
topology: tpu7x:2x2x1
jax: 0.10.0
libtpu: 0.0.40
codegen_flags: <defaults>
</compile_context>

<pallas_src>
import math

import jax
import jax.numpy as jnp
from jax.experimental import pallas as pl
from jax.experimental.pallas import tpu as pltpu


def _data_embedding_kernel(x_ref, w_ref, pe_ref, o_ref):
    # x_ref : (Bt, L, c_in)        input tile (Bt whole batch elements)
    # w_ref : (3*c_in, d_model)    fused conv taps, rows = [W_prev; W_cur; W_next]
    # pe_ref: (L, d_model)         positional embedding (shared across batch)
    # o_ref : (Bt, L, d_model)
    x = x_ref[...]
    bt, L, c_in = x.shape
    d_model = o_ref.shape[-1]

    # Circular time shifts computed on the VMEM-resident tile.
    x_prev = jnp.concatenate([x[:, L - 1:, :], x[:, :L - 1, :]], axis=1)  # x[:, (t-1) % L]
    x_next = jnp.concatenate([x[:, 1:, :], x[:, :1, :]], axis=1)          # x[:, (t+1) % L]

    # Fuse the three taps into one contraction: LHS (Bt, L, 3*c_in), K = 3*c_in.
    lhs = jnp.concatenate([x_prev, x, x_next], axis=-1)

    # Batched matmul (same dot_general structure as the flash-attention PV einsum).
    w = jnp.broadcast_to(w_ref[...][None], (bt, 3 * c_in, d_model))
    y = jnp.einsum("blk,bkd->bld", lhs, w, preferred_element_type=jnp.float32)

    # Positional embedding add (+ dropout p=0.0 == identity).
    o_ref[...] = (y + pe_ref[...][None, :, :]).astype(o_ref.dtype)


def _pick_batch_tile(B, L, c_in, d_model, vmem_budget_bytes=16 * 1024 * 1024):
    """Largest divisor Bt of B whose working set fits a conservative VMEM budget."""
    bytes_per_b = 4 * L * (
        2 * c_in          # input block, double buffered
        + 2 * d_model     # output block, double buffered
        + 3 * c_in        # fused LHS temporary
        + 3 * c_in        # broadcast RHS share (worst case)
        + d_model         # f32 result temporary
    )
    best = 1
    for bt in range(1, B + 1):
        if B % bt == 0 and bt * bytes_per_b <= vmem_budget_bytes:
            best = bt
    return best


def data_embedding(x, conv_weight, pe_table, *, batch_tile=None):
    """x: (B, L, c_in); conv_weight: (d_model, c_in, 3) [PyTorch Conv1d layout];
    pe_table: (max_len, d_model)."""
    B, L, c_in = x.shape
    d_model = conv_weight.shape[0]

    # Fused tap matrix: rows [0:c_in) pair with x[t-1] (tap 0), [c_in:2c_in) with
    # x[t] (tap 1), [2c_in:3c_in) with x[t+1] (tap 2).
    w_taps = jnp.transpose(conv_weight, (2, 1, 0)).astype(jnp.float32)   # (3, c_in, d_model)
    w_fused = w_taps.reshape(3 * c_in, d_model)                          # (3*c_in, d_model)

    pe = pe_table[:L, :].astype(jnp.float32)                             # (L, d_model)

    bt = batch_tile if batch_tile is not None else _pick_batch_tile(B, L, c_in, d_model)
    assert B % bt == 0, "batch tile must divide batch size"

    out = pl.pallas_call(
        _data_embedding_kernel,
        out_shape=jax.ShapeDtypeStruct((B, L, d_model), jnp.float32),
        grid_spec=pltpu.PrefetchScalarGridSpec(
            num_scalar_prefetch=0,
            grid=(B // bt,),
            in_specs=[
                pl.BlockSpec((bt, L, c_in), lambda b: (b, 0, 0)),
                pl.BlockSpec((3 * c_in, d_model), lambda b: (0, 0)),
                pl.BlockSpec((L, d_model), lambda b: (0, 0)),
            ],
            out_specs=pl.BlockSpec((bt, L, d_model), lambda b: (b, 0, 0)),
        ),
        compiler_params=pltpu.CompilerParams(
            dimension_semantics=("parallel",),
        ),
    )(x.astype(jnp.float32), w_fused, pe)
    return out


def make_positional_embedding(d_model, max_len=5000):
    pe = jnp.zeros((max_len, d_model), dtype=jnp.float32)
    position = jnp.arange(0, max_len, dtype=jnp.float32)[:, None]              # (max_len, 1)
    div_term = jnp.exp(jnp.arange(0, d_model, 2, dtype=jnp.float32)
                       * (-(math.log(10000.0) / d_model)))                     # (d_model/2,)
    pe = pe.at[:, 0::2].set(jnp.sin(position * div_term))
    pe = pe.at[:, 1::2].set(jnp.cos(position * div_term))
    return pe


def make_conv_weight(key, c_in, d_model):
    # kaiming_normal_(mode='fan_in', nonlinearity='leaky_relu') on (d_model, c_in, 3).
    negative_slope = 0.01
    gain = math.sqrt(2.0 / (1.0 + negative_slope ** 2))
    fan_in = c_in * 3
    std = gain / math.sqrt(fan_in)
    return std * jax.random.normal(key, (d_model, c_in, 3), dtype=jnp.float32)


def _reference(x, conv_weight, pe_table):
    # Pure-JAX reference with the original (three separate taps) formulation.
    B, L, c_in = x.shape
    x_pad = jnp.concatenate([x[:, -1:, :], x, x[:, :1, :]], axis=1)        # (B, L+2, c_in)
    w_taps = jnp.transpose(conv_weight, (2, 1, 0))                         # (3, c_in, d_model)
    y = (jnp.einsum("blc,cd->bld", x_pad[:, 0:L, :], w_taps[0])
         + jnp.einsum("blc,cd->bld", x_pad[:, 1:L + 1, :], w_taps[1])
         + jnp.einsum("blc,cd->bld", x_pad[:, 2:L + 2, :], w_taps[2]))
    return y + pe_table[None, :L, :]


if __name__ == "__main__":
    B, L, c_in, d_model = 2, 16, 4, 32

    key = jax.random.PRNGKey(0)
    kx, kw = jax.random.split(key)

    x = jax.random.normal(kx, (B, L, c_in), dtype=jnp.float32)
    conv_weight = make_conv_weight(kw, c_in, d_model)     # (d_model, c_in, 3), PyTorch layout
    pe_table = make_positional_embedding(d_model)          # (5000, d_model)

    out = data_embedding(x, conv_weight, pe_table)
    out = jax.block_until_ready(out)

    ref = _reference(x, conv_weight, pe_table)
    assert out.shape == (B, L, d_model)
    assert jnp.allclose(out, ref, atol=1e-4, rtol=1e-4), "Pallas output mismatch vs reference"

    print("KERNEL_OK")
</pallas_src>

<mosaic_0001>
module attributes {stable_mosaic.version = 11 : i64} {
  func.func @_data_embedding_kernel(%arg0: i32, %arg1: memref<2x16x4xf32, #tpu.memory_space<vmem>>, %arg2: memref<12x32xf32, #tpu.memory_space<vmem>>, %arg3: memref<16x32xf32, #tpu.memory_space<vmem>>, %arg4: memref<2x16x32xf32, #tpu.memory_space<vmem>>) attributes {dimension_semantics = [#tpu.dimension_semantics<parallel>], iteration_bounds = array<i64: 1>, scalar_prefetch = 0 : i64, scratch_operands = 0 : i64, tpu.core_type = #tpu.core_type<tc>, window_params = [{transform_indices = @transform_0, window_bounds = array<i64: 2, 16, 4>}, {pipeline_mode = #tpu.pipeline_mode<synchronous>, transform_indices = @transform_1, window_bounds = array<i64: 12, 32>}, {pipeline_mode = #tpu.pipeline_mode<synchronous>, transform_indices = @transform_2, window_bounds = array<i64: 16, 32>}, {transform_indices = @transform_3, window_bounds = array<i64: 2, 16, 32>}]} {
    %c0 = arith.constant 0 : index
    %c0_0 = arith.constant 0 : index
    %c0_1 = arith.constant 0 : index
    %0 = vector.load %arg1[%c0, %c0_0, %c0_1] : memref<2x16x4xf32, #tpu.memory_space<vmem>>, vector<2x16x4xf32>
    %1 = vector.extract_strided_slice %0 {offsets = [0, 15, 0], sizes = [2, 1, 4], strides = [1, 1, 1]} : vector<2x16x4xf32> to vector<2x1x4xf32>
    %2 = vector.extract_strided_slice %0 {offsets = [0, 0, 0], sizes = [2, 15, 4], strides = [1, 1, 1]} : vector<2x16x4xf32> to vector<2x15x4xf32>
    %3 = tpu.concatenate %1, %2 in 1 : vector<2x1x4xf32>, vector<2x15x4xf32> -> vector<2x16x4xf32>
    %4 = vector.extract_strided_slice %0 {offsets = [0, 1, 0], sizes = [2, 15, 4], strides = [1, 1, 1]} : vector<2x16x4xf32> to vector<2x15x4xf32>
    %5 = vector.extract_strided_slice %0 {offsets = [0, 0, 0], sizes = [2, 1, 4], strides = [1, 1, 1]} : vector<2x16x4xf32> to vector<2x1x4xf32>
    %6 = tpu.concatenate %4, %5 in 1 : vector<2x15x4xf32>, vector<2x1x4xf32> -> vector<2x16x4xf32>
    %7 = tpu.concatenate %3, %0, %6 in 2 : vector<2x16x4xf32>, vector<2x16x4xf32>, vector<2x16x4xf32> -> vector<2x16x12xf32>
    %c0_2 = arith.constant 0 : index
    %c0_3 = arith.constant 0 : index
    %8 = vector.load %arg2[%c0_2, %c0_3] : memref<12x32xf32, #tpu.memory_space<vmem>>, vector<12x32xf32>
    %9 = vector.shape_cast %8 : vector<12x32xf32> to vector<1x12x32xf32>
    %10 = vector.shape_cast %9 : vector<1x12x32xf32> to vector<1x12x32xf32>
    %11 = vector.broadcast %10 : vector<1x12x32xf32> to vector<2x12x32xf32>
    "tpu.trace_start"() <{level = 10 : i32, message = "blk,bkd->bld"}> : () -> ()
    %cst = arith.constant dense<0.000000e+00> : vector<2x16x32xf32>
    %12 = tpu.matmul %7, %11, %cst {dimension_numbers = #tpu.dot_dimension_numbers<[2], [1], [1], [2], [0, 0, 0, 1, 1, 2], [0], [0]>} : vector<2x16x12xf32>, vector<2x12x32xf32>, vector<2x16x32xf32> -> vector<2x16x32xf32>
    "tpu.trace_stop"() : () -> ()
    %c0_4 = arith.constant 0 : index
    %c0_5 = arith.constant 0 : index
    %13 = vector.load %arg3[%c0_4, %c0_5] : memref<16x32xf32, #tpu.memory_space<vmem>>, vector<16x32xf32>
    %14 = vector.shape_cast %13 : vector<16x32xf32> to vector<1x16x32xf32>
    %15 = vector.broadcast %14 : vector<1x16x32xf32> to vector<2x16x32xf32>
    %16 = arith.addf %12, %15 : vector<2x16x32xf32>
    %c0_6 = arith.constant 0 : index
    %c0_7 = arith.constant 0 : index
    %c0_8 = arith.constant 0 : index
    %17 = vector.load %arg4[%c0_6, %c0_7, %c0_8] : memref<2x16x32xf32, #tpu.memory_space<vmem>>, vector<2x16x32xf32>
    tpu.vector_store %arg4[%c0_6, %c0_7, %c0_8], %16 {strides = array<i32>} : memref<2x16x32xf32, #tpu.memory_space<vmem>>, vector<2x16x32xf32>,
    return
  }
  func.func @transform_0(%arg0: i32) -> (i32, i32, i32) {
    %c0_i32 = arith.constant 0 : i32
    %c0_i32_0 = arith.constant 0 : i32
    %c0_i32_1 = arith.constant 0 : i32
    return %arg0, %c0_i32, %c0_i32_0 : i32, i32, i32
  }
  func.func @transform_1(%arg0: i32) -> (i32, i32) {
    %c0_i32 = arith.constant 0 : i32
    %c0_i32_0 = arith.constant 0 : i32
    %c0_i32_1 = arith.constant 0 : i32
    return %c0_i32, %c0_i32_0 : i32, i32
  }
  func.func @transform_2(%arg0: i32) -> (i32, i32) {
    %c0_i32 = arith.constant 0 : i32
    %c0_i32_0 = arith.constant 0 : i32
    %c0_i32_1 = arith.constant 0 : i32
    return %c0_i32, %c0_i32_0 : i32, i32
  }
  func.func @transform_3(%arg0: i32) -> (i32, i32, i32) {
    %c0_i32 = arith.constant 0 : i32
    %c0_i32_0 = arith.constant 0 : i32
    %c0_i32_1 = arith.constant 0 : i32
    return %arg0, %c0_i32, %c0_i32_0 : i32, i32, i32
  }
}

</mosaic_0001>

<bundles_post_ra>
// kernel: tpu_custom_call.1
= control target key start
LH: loop header
LB: loop body
LE: loop exit
PB: predicated region body
PF: predicated region fallthrough
CT: control target
= control target key end

     0   :  { %s348_s18 = smov 4   ;;  %vm38_vm0 = vcmask 1046528   ;;  %vm27_vm1 = vcmask 1040384   ;;  %s422_s0 = inlined_call_operand.vmem [shape: f32[2,16,4], index: 0, kind: input, shape index: {}]   ;;  %s423_s1 = inlined_call_operand.vmem [shape: f32[12,32], index: 1, kind: input, shape index: {}]   ;;  %s424_s2 = inlined_call_operand.vmem [shape: f32[16,32], index: 2, kind: input, shape index: {}]   ;;  %s425_s3 = inlined_call_operand.hbm [shape: f32[2,16,32], index: 3, kind: output, shape index: {}]  }
   0x1   :  { %v16_v0 = vld [vmem:[%s422_s0 + $0x8] sm:$0xff]  ;;  %v15_v1 = vld [vmem:[%s422_s0] sm:$0xff]  ;;  %v18_v2 = vld [vmem:[%s422_s0 + $0x18] sm:$0xff] }
   0x2   :  { %53 = vrot.lane.b32.xlu1 %v16_v0, %s348_s18  ;;  %v21_v3 = vrot.slane %v16_v0, 7  ;;  %v40_v4 = vrot.slane %v16_v0, 1  ;;  %51 = vrot.lane.b32.xlu0 %v15_v1, %s348_s18  ;;  %v28_v5 = vrot.slane %v15_v1, 7  ;;  %v39_v6 = vrot.slane %v15_v1, 1  ;;  %v17_v7 = vld [vmem:[%s422_s0 + $0x10] sm:$0xff]  ;;  %v87_v8 = vld [vmem:[%s423_s1] sm:$0xff] }
   0x3   :  { %v22_v9 = vrot.slane %v18_v2, 7  ;;  %v43_v10 = vrot.slane %v18_v2, 1  ;;  %v30_v11 = vrot.slane %v17_v7, 7  ;;  %v42_v12 = vrot.slane %v17_v7, 1  ;;  %v88_v13 = vld [vmem:[%s423_s1 + $0x8] sm:$0xf] }
   0x4   :  { %8 = vsyncpa [#allocation3], 0  ;;  %v29_v14 = vsel %vm27_vm1, %v28_v5, %v21_v3  ;;  %v36_v15 = vsel %vm27_vm1, %v21_v3, %v28_v5  ;;  %vm98_vm2 = vcmask 1043456   ;;  %v307_v18 = vpack.c.bf16 %v88_v13, %v87_v8  ;;  %s350_s0 = smov 8   ;;  %v90_v39 = vld [vmem:[%s424_s2 + $0x8] sm:$0xff]  ;;  %v89_v40 = vld [vmem:[%s424_s2] sm:$0xff] }
   0x5   :  { %v31_v16 = vsel %vm27_vm1, %v30_v11, %v22_v9  ;;  %v37_v17 = vsel %vm27_vm1, %v22_v9, %v30_v11  ;;  %v44_v19 = vsel %vm38_vm0, %v42_v12, %v43_v10  ;;  %v41_v20 = vsel %vm38_vm0, %v39_v6, %v40_v4  ;;  %s351_s28 = smov [#allocation2]  }
   0x6   :  { %57 = vrot.lane.b32.xlu1 %v18_v2, %s348_s18  ;;  %55 = vrot.lane.b32.xlu0 %v17_v7, %s348_s18  ;;  %vm349_vm3 = vmmov 1   ;;  %v50_v21 = vsel %vm38_vm0, %v43_v10, %v42_v12  ;;  %v49_v22 = vsel %vm38_vm0, %v40_v4, %v39_v6  ;;  %vm77_vm5 = vcmask 31744   ;;  %s268_s29 = sshll.u32 %s351_s28, 4  ;;  %s269_s29 = int_to_ptr.vmem [resolvable:$true] %s268_s29 }
   0x7   :  { %vm308_vm4 = vmpackc.low %vm98_vm2, %vm349_vm3  ;;  %vm82_vm6 = vcmask 64512   ;;  %vm91_vm7 = vcmask 97280   ;;  %vm258_vm8 = vcmask 261120   ;;  %s324_s30 = scalar_lea.vmem %s269_s29, 512  ;;  %p329_p1 = scmp.lt.s32.totalorder %s269_s29, %s269_s29 }
   0x8   :  { %309 = vmatprep.subr.msk.bf16.mxu0 %vm308_vm4, %v307_v18  ;;  %315 = vmatprep.subr.msk.bf16.mxu1 %vm308_vm4, %v307_v18  ;;  %p325_p0 = scmp.ne.s32.totalorder %s269_s29, %s324_s30  ;;  %p330_p2 = scmp.lt.s32.totalorder %s324_s30, %s324_s30 }
   0x9   :  { %312 = vmatpush3.bf16.msk.msra.mxu0 %vm308_vm4, %v307_v18  ;;  %318 = vmatpush3.bf16.msk.msra.mxu1 %vm308_vm4, %v307_v18 }
   0xa   :  { %69 = vrot.lane.b32.xlu1 %v44_v19, %s350_s0  ;;  %65 = vrot.lane.b32.xlu0 %v41_v20, %s350_s0  ;;  %p331_p3 = por %p330_p2, %p329_p1 }
   0xc   :  { %p332_p4 = pnand %p331_p3, %p325_p0 }
   0xe   :  { %71 = vrot.lane.b32.xlu1 %v50_v21, %s350_s0  ;;  %67 = vrot.lane.b32.xlu0 %v49_v22, %s350_s0 }
  0x74   :  { %v54_v23 = vpop.permute.xlu1 %53  ;;  %v52_v24 = vpop.permute.xlu0 %51 }
  0x75   :  { %v78_v27 = vsel %vm77_vm5, %v36_v15, %v52_v24  ;;  %v79_v33 = vsel %vm77_vm5, %v29_v14, %v54_v23 }
  0x78   :  { %v58_v25 = vpop.permute.xlu1 %57  ;;  %v56_v26 = vpop.permute.xlu0 %55 }
  0x79   :  { %v80_v28 = vsel %vm77_vm5, %v37_v17, %v56_v26  ;;  %v81_v34 = vsel %vm77_vm5, %v31_v16, %v58_v25 }
  0x7c   :  { %v70_v29 = vpop.permute.xlu1 %69  ;;  %v66_v30 = vpop.permute.xlu0 %65 }
  0x7d   :  { %v83_v31 = vsel %vm82_vm6, %v78_v27, %v66_v30  ;;  %v85_v32 = vsel %vm82_vm6, %v80_v28, %v70_v29 }
  0x7e   :  { %297 = vmatprep.mubr.msk.f32.mxu0 %vm91_vm7, %v83_v31  ;;  %304 = vmatprep.mubr.msk.f32.mxu1 %vm91_vm7, %v85_v32 }
  0x80   :  { %v72_v35 = vpop.permute.xlu1 %71  ;;  %v68_v36 = vpop.permute.xlu0 %67 }
  0x81   :  { %v86_v37 = vsel %vm82_vm6, %v81_v34, %v72_v35  ;;  %v84_v38 = vsel %vm82_vm6, %v79_v33, %v68_v36 }
  0x82   :  { %298 = vmatmul.mubr.msk.f32.vlgmr.msra.gmra.mrb[0].mxu0 %vm91_vm7, %v84_v38  ;;  %305 = vmatmul.mubr.msk.f32.vlgmr.msra.gmra.mrb[0].mxu1 %vm91_vm7, %v86_v37 }
 0x155   :  { %v299_v41 = vpop.f32.mrb[0].mxu0  ;;  %v306_v42 = vpop.f32.mrb[0].mxu1 }
 0x156   :  { %v174_v43 = vadd.f32 %v299_v41, %v90_v39  ;;  %v255_v44 = vadd.f32 %v306_v42, %v90_v39  ;;  %v168_v45 = vpop.f32.mrb[1].mxu0  ;;  %v249_v46 = vpop.f32.mrb[1].mxu1 }
 0x157   :  { %v169_v47 = vadd.f32 %v168_v45, %v89_v40  ;;  %v250_v48 = vadd.f32 %v249_v46, %v89_v40 }
 0x158   :  { %260 = vst.msk [vmem:[#allocation2 + $0x8] sm:$0xff] %vm258_vm8, %v174_v43  ;;  %262 = vst.msk [vmem:[#allocation2 + $0x18] sm:$0xff] %vm258_vm8, %v255_v44 }
 0x159   :  { %259 = vst.msk [vmem:[#allocation2] sm:$0xff] %vm258_vm8, %v169_v47  ;;  %261 = vst.msk [vmem:[#allocation2 + $0x10] sm:$0xff] %vm258_vm8, %v250_v48 }
 0x15a   :  { %335 = shalt.err (!%p332_p4)
}
 0x15b   :  { %s336_s5 = scalar_lea.hbm %s425_s3, 512 }
 0x15c   :  { %p337_p5 = scmp.ne.s32.totalorder %s425_s3, %s336_s5  ;;  %p340_p6 = scmp.lt.u32.totalorder %s336_s5, %s425_s3 }
 0x15e   :  { %p342_p7 = pnand %p340_p6, %p337_p5 }
 0x160   :  { %345 = shalt.err (!%p342_p7)
}
 0x161   :  { %s352_s10 = smov 128  }
 0x162   :  { %274 = dma.vmem_to_hbm [thread:$0]  %s269_s29, 512, %s425_s3, [#allocation3], %s352_s10, %s352_s10, %s350_s0  }
 0x163   :  { %346 = dma.done.wait [#allocation3], 512  }
 0x164   :  { %347 = vsyncadd [#allocation3], 4294966784 }
 0x165   :  { %278 = vsyncpa [#allocation3], 1 }

</bundles_post_ra>
